<compile_context>
chip_gen: v7x
topology: tpu7x:2x2x1
jax: 0.10.0
libtpu: 0.0.40
codegen_flags: <defaults>
</compile_context>

<pallas_src>
import functools

import jax
import jax.numpy as jnp
from jax.experimental import pallas as pl
from jax.experimental.pallas import tpu as pltpu

HIDDEN = 32
LANE = 128


def _pinn_kernel(x_ref, w1_ref, b1_ref, w2_ref, b2_ref,
                 w3_ref, b3_ref, w4t_ref, b4_ref, o_ref, *, fast_math):
    # x_ref: (1, TB) lane-dense tile of collocation points.
    x = x_ref[...]                                           # (1, TB)

    # Layer 1: Linear(1, 32).  K == 1 -> VPU broadcast multiply-add.
    h = w1_ref[...] * x + b1_ref[...]                        # (32, TB)
    h = jnp.maximum(h, 0.0)                                  # ReLU

    # Layer 2: Linear(32, 32) on the MXU — W (out, in) @ H (in, TB).
    lhs2 = w2_ref[...]
    rhs2 = h.astype(jnp.bfloat16) if fast_math else h
    h = jnp.dot(lhs2, rhs2, preferred_element_type=jnp.float32)
    h = jnp.maximum(h + b2_ref[...], 0.0)                    # ReLU

    # Layer 3: Linear(32, 32) + Sigmoid.
    lhs3 = w3_ref[...]
    rhs3 = h.astype(jnp.bfloat16) if fast_math else h
    z = jnp.dot(lhs3, rhs3, preferred_element_type=jnp.float32) + b3_ref[...]
    if fast_math:
        # exp on the EUP + approx reciprocal on the EUP (both off the VPU slot).
        h = pl.reciprocal(1.0 + jnp.exp(-z), approx=True)
    else:
        h = jax.nn.sigmoid(z)

    # Layer 4: Linear(32, 1) as VPU scale + sublane (XLU) reduce -> (1, TB).
    out = jnp.sum(h * w4t_ref[...], axis=0, keepdims=True) + b4_ref[...]

    o_ref[...] = out.astype(o_ref.dtype)


def _round_up(x, m):
    return ((x + m - 1) // m) * m


def _num_tensorcores():
    """Best-effort detection of TensorCores per chip (2 on v7x, else 1)."""
    try:
        kind = jax.devices()[0].device_kind.lower()
        if "v7" in kind:
            return 2
    except Exception:
        pass
    return 1


@functools.partial(jax.jit, static_argnames=("block_batch", "fast_math"))
def pinn_forward(x, params, *, block_batch=16384, fast_math=False):
    """x: (N, 1) float32. params: PyTorch-layout weights. Returns (N, 1)."""
    assert block_batch % LANE == 0, "block_batch must be a multiple of 128"
    n = x.shape[0]

    # Tile size: lane-dense (multiple of 128), capped at block_batch.
    tb = min(block_batch, _round_up(max(n, 1), LANE))
    # v7x: give the "parallel" grid axis >= 2 steps so both TensorCores work.
    cores = _num_tensorcores()
    if cores > 1:
        tb_split = _round_up(-(-max(n, 1) // cores), LANE)
        tb = max(LANE, min(tb, tb_split))
    n_pad = _round_up(n, tb)
    grid = (n_pad // tb,)

    # Batch onto the lane axis: (N, 1) -> (1, N_pad). Pad only if needed.
    x_row = x.reshape(1, n)
    if n_pad != n:
        x_row = jnp.pad(x_row, ((0, 0), (0, n_pad - n)))

    # Kernel-side weight layout: W (out, in) (PyTorch native), biases as
    # (out, 1) columns, w4 transposed to a (32, 1) column for the reduce.
    mxu_dtype = jnp.bfloat16 if fast_math else jnp.float32
    w1 = params["w1"]                                  # (32, 1)
    b1 = params["b1"].reshape(HIDDEN, 1)
    w2 = params["w2"].astype(mxu_dtype)                # (32, 32)
    b2 = params["b2"].reshape(HIDDEN, 1)
    w3 = params["w3"].astype(mxu_dtype)                # (32, 32)
    b3 = params["b3"].reshape(HIDDEN, 1)
    w4t = params["w4"].T                               # (32, 1)
    b4 = params["b4"].reshape(1, 1)

    def full(arr):
        shape = arr.shape
        return pl.BlockSpec(shape, lambda i: (0,) * len(shape))

    cost = pl.CostEstimate(
        flops=2 * n_pad * (HIDDEN + 2 * HIDDEN * HIDDEN + HIDDEN),
        transcendentals=2 * HIDDEN * n_pad,            # exp + reciprocal
        bytes_accessed=8 * n_pad + 4 * (2 * HIDDEN * HIDDEN + 6 * HIDDEN + 2),
    )

    # Per-step VMEM: ~4 live (32, tb) f32 intermediates + double-buffered
    # (1, tb) in/out + weights.  Give 2x headroom, stay well under v7x 64 MiB.
    est_vmem = (4 * HIDDEN * tb * 4
                + 2 * 2 * tb * 4
                + 4 * (2 * HIDDEN * HIDDEN + 6 * HIDDEN + 2))
    vmem_limit = int(min(max(2 * est_vmem, 16 << 20), 40 << 20))

    out_row = pl.pallas_call(
        functools.partial(_pinn_kernel, fast_math=fast_math),
        out_shape=jax.ShapeDtypeStruct((1, n_pad), jnp.float32),
        grid_spec=pltpu.PrefetchScalarGridSpec(
            num_scalar_prefetch=0,
            grid=grid,
            in_specs=[
                pl.BlockSpec((1, tb), lambda i: (0, i)),   # x tile (lane-dense)
                full(w1), full(b1),
                full(w2), full(b2),
                full(w3), full(b3),
                full(w4t), full(b4),
            ],
            out_specs=pl.BlockSpec((1, tb), lambda i: (0, i)),
        ),
        compiler_params=pltpu.CompilerParams(
            dimension_semantics=("parallel",),
            vmem_limit_bytes=vmem_limit),
        cost_estimate=cost,
    )(x_row, w1, b1, w2, b2, w3, b3, w4t, b4)

    if n_pad != n:
        out_row = out_row[:, :n]
    return out_row.reshape(n, 1)


def init_params(key):
    """nn.Linear default init, PyTorch layout: W (out,in), b (out,)."""
    def linear(key, fan_in, fan_out):
        kw, kb = jax.random.split(key)
        bound = 1.0 / (fan_in ** 0.5)
        w = jax.random.uniform(kw, (fan_out, fan_in), jnp.float32,
                               minval=-bound, maxval=bound)
        b = jax.random.uniform(kb, (fan_out,), jnp.float32,
                               minval=-bound, maxval=bound)
        return w, b

    k1, k2, k3, k4 = jax.random.split(key, 4)
    w1, b1 = linear(k1, 1, HIDDEN)
    w2, b2 = linear(k2, HIDDEN, HIDDEN)
    w3, b3 = linear(k3, HIDDEN, HIDDEN)
    w4, b4 = linear(k4, HIDDEN, 1)
    return dict(w1=w1, b1=b1, w2=w2, b2=b2, w3=w3, b3=b3, w4=w4, b4=b4)


def pinn_reference(x, params):
    """Pure-JAX reference (PyTorch semantics: x @ W.T + b)."""
    h = jnp.maximum(x @ params["w1"].T + params["b1"], 0.0)
    h = jnp.maximum(h @ params["w2"].T + params["b2"], 0.0)
    h = jax.nn.sigmoid(h @ params["w3"].T + params["b3"])
    return h @ params["w4"].T + params["b4"]


if __name__ == "__main__":
    key = jax.random.PRNGKey(0)
    kp, kx, kx2 = jax.random.split(key, 3)

    params = init_params(kp)

    # Small batch of scalar collocation points, shape (N, 1).
    N = 16
    x = jax.random.uniform(kx, (N, 1), jnp.float32, minval=-1.0, maxval=1.0)
    out = jax.block_until_ready(pinn_forward(x, params))
    ref = pinn_reference(x, params)
    assert out.shape == (N, 1)
    assert jnp.allclose(out, ref, atol=1e-5, rtol=1e-5), "mismatch vs reference"

    # Non-multiple batch + multi-step grid (padded tail path, small tiles).
    N2 = 300
    x2 = jax.random.uniform(kx2, (N2, 1), jnp.float32, minval=-1.0, maxval=1.0)
    out2 = jax.block_until_ready(pinn_forward(x2, params, block_batch=128))
    ref2 = pinn_reference(x2, params)
    assert out2.shape == (N2, 1)
    assert jnp.allclose(out2, ref2, atol=1e-5, rtol=1e-5), "mismatch (tail)"

    # fast_math path: bf16 MXU operands + EUP sigmoid (looser tolerance).
    out3 = jax.block_until_ready(pinn_forward(x2, params, fast_math=True))
    assert out3.shape == (N2, 1)
    assert jnp.allclose(out3, ref2, atol=2e-2, rtol=2e-2), "mismatch (fast_math)"

    print("KERNEL_OK")
</pallas_src>

<mosaic_0001>
module attributes {stable_mosaic.version = 11 : i64} {
  func.func @_pinn_kernel(%arg0: i32, %arg1: memref<1x128xf32, #tpu.memory_space<vmem>>, %arg2: memref<32x1xf32, #tpu.memory_space<vmem>>, %arg3: memref<32x1xf32, #tpu.memory_space<vmem>>, %arg4: memref<32x32xf32, #tpu.memory_space<vmem>>, %arg5: memref<32x1xf32, #tpu.memory_space<vmem>>, %arg6: memref<32x32xf32, #tpu.memory_space<vmem>>, %arg7: memref<32x1xf32, #tpu.memory_space<vmem>>, %arg8: memref<32x1xf32, #tpu.memory_space<vmem>>, %arg9: memref<1x1xf32, #tpu.memory_space<vmem>>, %arg10: memref<1x128xf32, #tpu.memory_space<vmem>>) attributes {dimension_semantics = [#tpu.dimension_semantics<parallel>], iteration_bounds = array<i64: 1>, scalar_prefetch = 0 : i64, scratch_operands = 0 : i64, tpu.core_type = #tpu.core_type<tc>, window_params = [{transform_indices = @transform_0, window_bounds = array<i64: 1, 128>}, {pipeline_mode = #tpu.pipeline_mode<synchronous>, transform_indices = @transform_1, window_bounds = array<i64: 32, 1>}, {pipeline_mode = #tpu.pipeline_mode<synchronous>, transform_indices = @transform_2, window_bounds = array<i64: 32, 1>}, {pipeline_mode = #tpu.pipeline_mode<synchronous>, transform_indices = @transform_3, window_bounds = array<i64: 32, 32>}, {pipeline_mode = #tpu.pipeline_mode<synchronous>, transform_indices = @transform_4, window_bounds = array<i64: 32, 1>}, {pipeline_mode = #tpu.pipeline_mode<synchronous>, transform_indices = @transform_5, window_bounds = array<i64: 32, 32>}, {pipeline_mode = #tpu.pipeline_mode<synchronous>, transform_indices = @transform_6, window_bounds = array<i64: 32, 1>}, {pipeline_mode = #tpu.pipeline_mode<synchronous>, transform_indices = @transform_7, window_bounds = array<i64: 32, 1>}, {pipeline_mode = #tpu.pipeline_mode<synchronous>, transform_indices = @transform_8, window_bounds = array<i64: 1, 1>}, {transform_indices = @transform_9, window_bounds = array<i64: 1, 128>}]} {
    %c0 = arith.constant 0 : index
    %c0_0 = arith.constant 0 : index
    %0 = vector.load %arg1[%c0, %c0_0] : memref<1x128xf32, #tpu.memory_space<vmem>>, vector<1x128xf32>
    %c0_1 = arith.constant 0 : index
    %c0_2 = arith.constant 0 : index
    %1 = vector.load %arg2[%c0_1, %c0_2] : memref<32x1xf32, #tpu.memory_space<vmem>>, vector<32x1xf32>
    %2 = vector.broadcast %1 : vector<32x1xf32> to vector<32x128xf32>
    %3 = vector.broadcast %0 : vector<1x128xf32> to vector<32x128xf32>
    %4 = arith.mulf %2, %3 : vector<32x128xf32>
    %c0_3 = arith.constant 0 : index
    %c0_4 = arith.constant 0 : index
    %5 = vector.load %arg3[%c0_3, %c0_4] : memref<32x1xf32, #tpu.memory_space<vmem>>, vector<32x1xf32>
    %6 = vector.broadcast %5 : vector<32x1xf32> to vector<32x128xf32>
    %7 = arith.addf %4, %6 : vector<32x128xf32>
    %cst = arith.constant 0.000000e+00 : f32
    %8 = vector.broadcast %cst : f32 to vector<32x128xf32>
    %9 = arith.maximumf %7, %8 : vector<32x128xf32>
    %c0_5 = arith.constant 0 : index
    %c0_6 = arith.constant 0 : index
    %10 = vector.load %arg4[%c0_5, %c0_6] : memref<32x32xf32, #tpu.memory_space<vmem>>, vector<32x32xf32>
    %cst_7 = arith.constant dense<0.000000e+00> : vector<32x128xf32>
    %11 = tpu.matmul %10, %9, %cst_7 {dimension_numbers = #tpu.dot_dimension_numbers<[1], [0], [0], [1], [0, 0, 1, 1], [], []>} : vector<32x32xf32>, vector<32x128xf32>, vector<32x128xf32> -> vector<32x128xf32>
    %c0_8 = arith.constant 0 : index
    %c0_9 = arith.constant 0 : index
    %12 = vector.load %arg5[%c0_8, %c0_9] : memref<32x1xf32, #tpu.memory_space<vmem>>, vector<32x1xf32>
    %13 = vector.broadcast %12 : vector<32x1xf32> to vector<32x128xf32>
    %14 = arith.addf %11, %13 : vector<32x128xf32>
    %cst_10 = arith.constant 0.000000e+00 : f32
    %15 = vector.broadcast %cst_10 : f32 to vector<32x128xf32>
    %16 = arith.maximumf %14, %15 : vector<32x128xf32>
    %c0_11 = arith.constant 0 : index
    %c0_12 = arith.constant 0 : index
    %17 = vector.load %arg6[%c0_11, %c0_12] : memref<32x32xf32, #tpu.memory_space<vmem>>, vector<32x32xf32>
    %cst_13 = arith.constant dense<0.000000e+00> : vector<32x128xf32>
    %18 = tpu.matmul %17, %16, %cst_13 {dimension_numbers = #tpu.dot_dimension_numbers<[1], [0], [0], [1], [0, 0, 1, 1], [], []>} : vector<32x32xf32>, vector<32x128xf32>, vector<32x128xf32> -> vector<32x128xf32>
    %c0_14 = arith.constant 0 : index
    %c0_15 = arith.constant 0 : index
    %19 = vector.load %arg7[%c0_14, %c0_15] : memref<32x1xf32, #tpu.memory_space<vmem>>, vector<32x1xf32>
    %20 = vector.broadcast %19 : vector<32x1xf32> to vector<32x128xf32>
    %21 = arith.addf %18, %20 : vector<32x128xf32>
    %22 = arith.negf %21 : vector<32x128xf32>
    %23 = math.exp %22 : vector<32x128xf32>
    %cst_16 = arith.constant 1.000000e+00 : f32
    %24 = vector.broadcast %cst_16 : f32 to vector<32x128xf32>
    %25 = arith.addf %24, %23 : vector<32x128xf32>
    %26 = arith.divf %24, %25 : vector<32x128xf32>
    %c0_17 = arith.constant 0 : index
    %c0_18 = arith.constant 0 : index
    %27 = vector.load %arg8[%c0_17, %c0_18] : memref<32x1xf32, #tpu.memory_space<vmem>>, vector<32x1xf32>
    %28 = vector.broadcast %27 : vector<32x1xf32> to vector<32x128xf32>
    %29 = arith.mulf %26, %28 : vector<32x128xf32>
    %cst_19 = arith.constant dense<0.000000e+00> : vector<128xf32>
    %30 = vector.multi_reduction <add>, %29, %cst_19 [0] : vector<32x128xf32> to vector<128xf32>
    %31 = vector.shape_cast %30 : vector<128xf32> to vector<1x128xf32>
    %c0_20 = arith.constant 0 : index
    %c0_21 = arith.constant 0 : index
    %32 = vector.load %arg9[%c0_20, %c0_21] : memref<1x1xf32, #tpu.memory_space<vmem>>, vector<1x1xf32>
    %33 = vector.broadcast %32 : vector<1x1xf32> to vector<1x128xf32>
    %34 = arith.addf %31, %33 : vector<1x128xf32>
    %c0_22 = arith.constant 0 : index
    %c0_23 = arith.constant 0 : index
    %35 = vector.load %arg10[%c0_22, %c0_23] : memref<1x128xf32, #tpu.memory_space<vmem>>, vector<1x128xf32>
    tpu.vector_store %arg10[%c0_22, %c0_23], %34 {strides = array<i32>} : memref<1x128xf32, #tpu.memory_space<vmem>>, vector<1x128xf32>,
    return
  }
  func.func @transform_0(%arg0: i32) -> (i32, i32) {
    %c0_i32 = arith.constant 0 : i32
    %c0_i32_0 = arith.constant 0 : i32
    return %c0_i32, %arg0 : i32, i32
  }
  func.func @transform_1(%arg0: i32) -> (i32, i32) {
    %c0_i32 = arith.constant 0 : i32
    %c0_i32_0 = arith.constant 0 : i32
    %c0_i32_1 = arith.constant 0 : i32
    return %c0_i32, %c0_i32_0 : i32, i32
  }
  func.func @transform_2(%arg0: i32) -> (i32, i32) {
    %c0_i32 = arith.constant 0 : i32
    %c0_i32_0 = arith.constant 0 : i32
    %c0_i32_1 = arith.constant 0 : i32
    return %c0_i32, %c0_i32_0 : i32, i32
  }
  func.func @transform_3(%arg0: i32) -> (i32, i32) {
    %c0_i32 = arith.constant 0 : i32
    %c0_i32_0 = arith.constant 0 : i32
    %c0_i32_1 = arith.constant 0 : i32
    return %c0_i32, %c0_i32_0 : i32, i32
  }
  func.func @transform_4(%arg0: i32) -> (i32, i32) {
    %c0_i32 = arith.constant 0 : i32
    %c0_i32_0 = arith.constant 0 : i32
    %c0_i32_1 = arith.constant 0 : i32
    return %c0_i32, %c0_i32_0 : i32, i32
  }
  func.func @transform_5(%arg0: i32) -> (i32, i32) {
    %c0_i32 = arith.constant 0 : i32
    %c0_i32_0 = arith.constant 0 : i32
    %c0_i32_1 = arith.constant 0 : i32
    return %c0_i32, %c0_i32_0 : i32, i32
  }
  func.func @transform_6(%arg0: i32) -> (i32, i32) {
    %c0_i32 = arith.constant 0 : i32
    %c0_i32_0 = arith.constant 0 : i32
    %c0_i32_1 = arith.constant 0 : i32
    return %c0_i32, %c0_i32_0 : i32, i32
  }
  func.func @transform_7(%arg0: i32) -> (i32, i32) {
    %c0_i32 = arith.constant 0 : i32
    %c0_i32_0 = arith.constant 0 : i32
    %c0_i32_1 = arith.constant 0 : i32
    return %c0_i32, %c0_i32_0 : i32, i32
  }
  func.func @transform_8(%arg0: i32) -> (i32, i32) {
    %c0_i32 = arith.constant 0 : i32
    %c0_i32_0 = arith.constant 0 : i32
    %c0_i32_1 = arith.constant 0 : i32
    return %c0_i32, %c0_i32_0 : i32, i32
  }
  func.func @transform_9(%arg0: i32) -> (i32, i32) {
    %c0_i32 = arith.constant 0 : i32
    %c0_i32_0 = arith.constant 0 : i32
    return %c0_i32, %arg0 : i32, i32
  }
}

</mosaic_0001>

<bundles_post_ra>
// kernel: pinn_forward.1
= control target key start
LH: loop header
LB: loop body
LE: loop exit
PB: predicated region body
PF: predicated region fallthrough
CT: control target
= control target key end

     0   :  { %v525_v0 = vmov 0   ;;  %vm129_vm0 = vcmask 261120   ;;  %s677_s2 = inlined_call_operand.vmem [shape: f32[32,1], index: 2, kind: input, shape index: {}]   ;;  %s678_s1 = inlined_call_operand.vmem [shape: f32[32,1], index: 1, kind: input, shape index: {}]   ;;  %s679_s8 = inlined_call_operand.<no memory space> [shape: f32[1,1], index: 8, kind: input, shape index: {}]   ;;  %s680_s4 = inlined_call_operand.vmem [shape: f32[32,1], index: 4, kind: input, shape index: {}]   ;;  %s681_s6 = inlined_call_operand.vmem [shape: f32[32,1], index: 6, kind: input, shape index: {}]   ;;  %s682_s3 = inlined_call_operand.vmem [shape: f32[32,32], index: 3, kind: input, shape index: {}]   ;;  %s683_s7 = inlined_call_operand.vmem [shape: f32[32,1], index: 7, kind: input, shape index: {}]   ;;  %s684_s0 = inlined_call_operand.vmem [shape: f32[1,128], index: 0, kind: input, shape index: {}]   ;;  %s685_s5 = inlined_call_operand.vmem [shape: f32[32,32], index: 5, kind: input, shape index: {}]   ;;  %s686_s9 = inlined_call_operand.vmem [shape: f32[1,128], index: 9, kind: output, shape index: {}]  }
   0x1   :  { %508 = vset.pattern.permute.xlu1 %v525_v0  ;;  %507 = vset.pattern.permute.xlu0 %v525_v0  ;;  %v69_v1 = vld [vmem:[%s677_s2] sm:$0xff]  ;;  %v14_v3 = vstv %s679_s8  ;;  %v70_v4 = vld [vmem:[%s677_s2 + $0x8] sm:$0xff]  ;;  %v38_v6 = vld [vmem:[%s678_s1 + $0x18] sm:$0xff] }
   0x2   :  { %v35_v2 = vld [vmem:[%s678_s1] sm:$0xff]  ;;  %75 = vperm.xlu1 %508, %v69_v1   ;;  %15 = vst [vmem:[#allocation2] sm:$0x1] %v14_v3  ;;  %v36_v5 = vld [vmem:[%s678_s1 + $0x8] sm:$0xff]  ;;  %v37_v7 = vld [vmem:[%s678_s1 + $0x10] sm:$0xff] }
   0x3   :  { %41 = vperm.xlu0 %507, %v35_v2   ;;  %v72_v8 = vld [vmem:[%s677_s2 + $0x18] sm:$0xff]  ;;  %v71_v9 = vld [vmem:[%s677_s2 + $0x10] sm:$0xff]  ;;  %v106_v10 = vld [vmem:[%s680_s4 + $0x8] sm:$0xff] }
   0x4   :  { %v105_v11 = vld [vmem:[%s680_s4] sm:$0xff]  ;;  %v108_v12 = vld [vmem:[%s680_s4 + $0x18] sm:$0xff]  ;;  %v107_v13 = vld [vmem:[%s680_s4 + $0x10] sm:$0xff] }
   0x5   :  { %v101_v14 = vld [vmem:[%s682_s3] sm:$0xff]  ;;  %v236_v15 = vld [vmem:[%s681_s6 + $0x8] sm:$0xff]  ;;  %v238_v17 = vld [vmem:[%s681_s6 + $0x18] sm:$0xff] }
   0x6   :  { %80 = vperm.xlu1 %508, %v70_v4   ;;  %v235_v16 = vld [vmem:[%s681_s6] sm:$0xff]  ;;  %470 = vmatprep.mubr.msk.f32.mxu0 %vm129_vm0, %v101_v14  ;;  %v237_v18 = vld [vmem:[%s681_s6 + $0x10] sm:$0xff]  ;;  %v381_v19 = vld [vmem:[%s683_s7 + $0x8] sm:$0xff] }
   0x7   :  { %46 = vperm.xlu0 %507, %v36_v5   ;;  %v380_v20 = vld [vmem:[%s683_s7] sm:$0xff]  ;;  %v383_v21 = vld [vmem:[%s683_s7 + $0x18] sm:$0xff]  ;;  %v382_v22 = vld [vmem:[%s683_s7 + $0x10] sm:$0xff] }
   0x8   :  { %v433_v24 = vld [vmem:[%s684_s0] ss:$0 sm:$0xff]  ;;  %v102_v47 = vld [vmem:[%s682_s3 + $0x8] sm:$0xff]  ;;  %v103_v48 = vld [vmem:[%s682_s3 + $0x10] sm:$0xff] }
   0x9   :  { %v417_v23 = vld [vmem:[#allocation2] sm:$0x1]  ;;  %v104_v49 = vld [vmem:[%s682_s3 + $0x18] sm:$0xff]  ;;  %v232_v5 = vld [vmem:[%s685_s5 + $0x8] sm:$0xff] }
   0xa   :  { %56 = vperm.xlu1 %508, %v38_v6   ;;  %v231_v50 = vld [vmem:[%s685_s5] sm:$0xff]  ;;  %v233_v6 = vld [vmem:[%s685_s5 + $0x10] sm:$0xff] }
   0xb   :  { %51 = vperm.xlu0 %507, %v37_v7   ;;  %484 = vmatprep.mubr.msk.f32.mxu1 %vm129_vm0, %v231_v50  ;;  %v234_v7 = vld [vmem:[%s685_s5 + $0x18] sm:$0xff] }
   0xe   :  { %90 = vperm.xlu1 %508, %v72_v8  }
   0xf   :  { %85 = vperm.xlu0 %507, %v71_v9  }
  0x12   :  { %116 = vperm.xlu1 %508, %v106_v10  }
  0x13   :  { %111 = vperm.xlu0 %507, %v105_v11  }
  0x16   :  { %126 = vperm.xlu1 %508, %v108_v12  }
  0x17   :  { %121 = vperm.xlu0 %507, %v107_v13  }
  0x1a   :  { %246 = vperm.xlu1 %508, %v236_v15  }
  0x1b   :  { %241 = vperm.xlu0 %507, %v235_v16  }
  0x1e   :  { %256 = vperm.xlu1 %508, %v238_v17  }
  0x1f   :  { %251 = vperm.xlu0 %507, %v237_v18  }
  0x22   :  { %391 = vperm.xlu1 %508, %v381_v19  }
  0x23   :  { %386 = vperm.xlu0 %507, %v380_v20  }
  0x26   :  { %401 = vperm.xlu1 %508, %v383_v21  }
  0x27   :  { %396 = vperm.xlu0 %507, %v382_v22  }
  0x2b   :  { %420 = vperm.xlu0 %507, %v417_v23  }
  0x81   :  { %v76_v25 = vpop.permute.xlu1 %75 }
  0x82   :  { %v42_v26 = vpop.permute.xlu0 %41 }
  0x83   :  { %v65_v27 = vmul.f32 %v433_v24, %v42_v26 }
  0x85   :  { %v81_v28 = vpop.permute.xlu1 %80  ;;  %v93_v30 = vadd.f32 %v76_v25, %v65_v27 }
  0x86   :  { %v47_v29 = vpop.permute.xlu0 %46 }
  0x87   :  { %v66_v31 = vmul.f32 %v433_v24, %v47_v29  ;;  %v97_v35 = vmax.f32 %v93_v30, 0.0 }
  0x89   :  { %v94_v32 = vadd.f32 %v81_v28, %v66_v31  ;;  %v57_v33 = vpop.permute.xlu1 %56 }
  0x8a   :  { %v52_v34 = vpop.permute.xlu0 %51  ;;  %v68_v37 = vmul.f32 %v433_v24, %v57_v33 }
  0x8b   :  { %v98_v36 = vmax.f32 %v94_v32, 0.0  ;;  %v67_v38 = vmul.f32 %v433_v24, %v52_v34 }
  0x8d   :  { %v490_v39 = vpack.c.bf16 %v98_v36, %v97_v35  ;;  %v91_v40 = vpop.permute.xlu1 %90 }
  0x8e   :  { %v86_v41 = vpop.permute.xlu0 %85  ;;  %v96_v42 = vadd.f32 %v91_v40, %v68_v37 }
  0x8f   :  { %v95_v43 = vadd.f32 %v86_v41, %v67_v38  ;;  %491 = vmatprep.subr.bf16.mxu0 %v490_v39 }
  0x90   :  { %493 = vmatpush3.bf16.msra.mxu0 %v490_v39  ;;  %v100_v44 = vmax.f32 %v96_v42, 0.0 }
  0x91   :  { %v99_v45 = vmax.f32 %v95_v43, 0.0  ;;  %v117_v51 = vpop.permute.xlu1 %116 }
  0x92   :  { %v112_v52 = vpop.permute.xlu0 %111 }
  0x93   :  { %v494_v46 = vpack.c.bf16 %v100_v44, %v99_v45 }
  0x95   :  { %495 = vmatprep.subr.bf16.mxu0 %v494_v46  ;;  %v127_v58 = vpop.permute.xlu1 %126 }
  0x96   :  { %497 = vmatpush3.bf16.msra.mxu0 %v494_v46  ;;  %v122_v61 = vpop.permute.xlu0 %121  ;;  %v423_v46 = vlaneseq }
  0x99   :  { %471 = vmatmul.mubr.msk.f32.vlgmr.msra.gmra.mrb[0].mxu0 %vm129_vm0, %v102_v47  ;;  %v247_v8 = vpop.permute.xlu1 %246 }
  0x9a   :  { %473 = vmatprep.mubr.msk.f32.mxu0 %vm129_vm0, %v103_v48  ;;  %v242_v9 = vpop.permute.xlu0 %241 }
  0x9d   :  { %474 = vmatmul.mubr.msk.f32.gmra.mrb[2].mxu0 %vm129_vm0, %v104_v49  ;;  %v257_v15 = vpop.permute.xlu1 %256  ;;  %v424_v49 = vshrl.u32 %v423_v46, 7 }
  0x9e   :  { %v252_v18 = vpop.permute.xlu0 %251 }
  0xa1   :  { %v392_v34 = vpop.permute.xlu1 %391 }
  0xa2   :  { %v387_v32 = vpop.permute.xlu0 %386 }
  0xa5   :  { %v402_v43 = vpop.permute.xlu1 %401 }
  0xa6   :  { %v397_v41 = vpop.permute.xlu0 %396 }
 0x16c   :  { %v472_v53 = vpop.f32.mrb[0].mxu0 }
 0x16d   :  { %v214_v54 = vadd.f32 %v472_v53, %v117_v51  ;;  %v208_v55 = vpop.f32.mrb[1].mxu0 }
 0x16e   :  { %v209_v56 = vadd.f32 %v208_v55, %v112_v52  ;;  %v425_v52 = vsub.s32 0, %v424_v49 }
 0x16f   :  { %v228_v57 = vmax.f32 %v214_v54, 0.0  ;;  %v421_v54 = vpop.permute.xlu0 %420 }
 0x170   :  { %v227_v59 = vmax.f32 %v209_v56, 0.0  ;;  %v475_v60 = vpop.f32.mrb[2].mxu0  ;;  %v426_v56 = vrot.slane %v421_v54, %v425_v52 }
 0x171   :  { %v224_v62 = vadd.f32 %v475_v60, %v127_v58  ;;  %v218_v63 = vpop.f32.mrb[3].mxu0 }
 0x172   :  { %v219_v0 = vadd.f32 %v218_v63, %v122_v61  ;;  %v498_v1 = vpack.c.bf16 %v228_v57, %v227_v59 }
 0x173   :  { %v230_v2 = vmax.f32 %v224_v62, 0.0 }
 0x174   :  { %v229_v3 = vmax.f32 %v219_v0, 0.0  ;;  %499 = vmatprep.subr.bf16.mxu1 %v498_v1 }
 0x175   :  { %501 = vmatpush3.bf16.msra.mxu1 %v498_v1 }
 0x176   :  { %v502_v4 = vpack.c.bf16 %v230_v2, %v229_v3 }
 0x178   :  { %503 = vmatprep.subr.bf16.mxu1 %v502_v4 }
 0x179   :  { %505 = vmatpush3.bf16.msra.mxu1 %v502_v4 }
 0x17c   :  { %485 = vmatmul.mubr.msk.f32.vlgmr.msra.gmra.mrb[0].mxu1 %vm129_vm0, %v232_v5 }
 0x17d   :  { %487 = vmatprep.mubr.msk.f32.mxu1 %vm129_vm0, %v233_v6 }
 0x180   :  { %488 = vmatmul.mubr.msk.f32.gmra.mrb[2].mxu1 %vm129_vm0, %v234_v7 }
 0x24f   :  { %v486_v10 = vpop.f32.mrb[0].mxu1 }
 0x250   :  { %v343_v11 = vadd.f32 %v486_v10, %v247_v8  ;;  %v337_v12 = vpop.f32.mrb[1].mxu1 }
 0x251   :  { %v338_v13 = vadd.f32 %v337_v12, %v242_v9 }
 0x252   :  { %v443_v14 = vmul.f32 -1.442695, %v343_v11 }
 0x253   :  { %v442_v16 = vmul.f32 -1.442695, %v338_v13  ;;  %v489_v17 = vpop.f32.mrb[2].mxu1 }
 0x254   :  { %509 = vpow2.f32 %v443_v14  ;;  %v353_v19 = vadd.f32 %v489_v17, %v257_v15  ;;  %v347_v20 = vpop.f32.mrb[3].mxu1 }
 0x255   :  { %511 = vpow2.f32 %v442_v16  ;;  %v348_v21 = vadd.f32 %v347_v20, %v252_v18 }
 0x256   :  { %v445_v22 = vmul.f32 -1.442695, %v353_v19 }
 0x257   :  { %v444_v23 = vmul.f32 -1.442695, %v348_v21 }
 0x258   :  { %513 = vpow2.f32 %v445_v22 }
 0x259   :  { %515 = vpow2.f32 %v444_v23 }
 0x25e   :  { %v510_v24 = vpop.eup %509 }
 0x25f   :  { %v512_v25 = vpop.eup %511  ;;  %v369_v26 = vadd.f32 1.0, %v510_v24 }
 0x260   :  { %v368_v27 = vadd.f32 1.0, %v512_v25 }
 0x261   :  { %517 = vrcp.f32 %v369_v26 }
 0x262   :  { %v514_v28 = vpop.eup %513  ;;  %519 = vrcp.f32 %v368_v27 }
 0x263   :  { %v516_v29 = vpop.eup %515  ;;  %v371_v30 = vadd.f32 1.0, %v514_v28 }
 0x264   :  { %v370_v31 = vadd.f32 1.0, %v516_v29 }
 0x265   :  { %521 = vrcp.f32 %v371_v30 }
 0x266   :  { %523 = vrcp.f32 %v370_v31 }
 0x26b   :  { %v518_v33 = vpop.eup %517 }
 0x26c   :  { %v520_v35 = vpop.eup %519  ;;  %v405_v36 = vmul.f32 %v518_v33, %v392_v34 }
 0x26d   :  { %v404_v37 = vmul.f32 %v520_v35, %v387_v32 }
 0x26f   :  { %v522_v38 = vpop.eup %521  ;;  %v408_v39 = vadd.f32 %v405_v36, %v404_v37 }
 0x270   :  { %v524_v40 = vpop.eup %523  ;;  %v407_v44 = vmul.f32 %v522_v38, %v402_v43 }
 0x271   :  { %v406_v42 = vmul.f32 %v524_v40, %v397_v41 }
 0x273   :  { %v409_v45 = vadd.f32 %v408_v39, %v406_v42 }
 0x275   :  { %v410_v47 = vadd.f32 %v409_v45, %v407_v44 }
 0x277   :  { %v411_v48 = vrot.slane %v410_v47, 4 }
 0x279   :  { %v412_v50 = vadd.f32 %v411_v48, %v410_v47 }
 0x27b   :  { %v413_v51 = vrot.slane %v412_v50, 2 }
 0x27d   :  { %v414_v53 = vadd.f32 %v413_v51, %v412_v50 }
 0x27f   :  { %v415_v55 = vrot.slane %v414_v53, 1 }
 0x281   :  { %v416_v57 = vadd.f32 %v415_v55, %v414_v53 }
 0x283   :  { %v427_v58 = vadd.f32 %v426_v56, %v416_v57 }
 0x285   :  { %428 = vst [vmem:[%s686_s9] sm:$0x1] %v427_v58 }

</bundles_post_ra>
